<compile_context>
chip_gen: v6e
topology: v6e:2x2x1
jax: 0.10.0
libtpu: 0.0.40
codegen_flags: <defaults>
</compile_context>

<pallas_src>
import functools

import jax
import jax.numpy as jnp
from jax.experimental import pallas as pl
from jax.experimental.pallas import tpu as pltpu


def _cnn_kernel(x_ref, w_ref, bm_ref, wfc_ref, bfc_ref, out_ref, *, lp, c4p):
    # x_ref  : [TB, Lp, D]    zero-padded embedded batch block (compute dtype)
    # w_ref  : [D, 5*C4p]     all 4 conv branches; kernel position packed into N
    # bm_ref : [Lp, C4p]      per-position bias (valid) or -1e30 (invalid), f32
    # wfc_ref: [C4p, OUTp]    zero-padded fc weight (compute dtype)
    # bfc_ref: [1, OUTp]      zero-padded fc bias, f32
    # out_ref: [TB, OUTp]     logits (lane-dense, 128-wide)
    tb = x_ref.shape[0]
    d = x_ref.shape[2]
    m = tb * lp

    # One wide MXU matmul on the un-shifted slab (N = 5*C4p >= 640).
    xf = x_ref[...].reshape(m, d)                     # free: lp % 8 == 0
    y = jnp.dot(xf, w_ref[...], preferred_element_type=jnp.float32)  # [m, 5*c4p]

    # Combine the 5 kernel-position strips with sublane rolls instead of five
    # misaligned slice+reshape copies of x.  shift = m - dk  ==  roll "up" by dk,
    # i.e. rolled[s] = y[s + dk].  Wrapped rows land at positions s >= S which
    # the -1e30 mask below removes before the time max.
    acc = y[:, 0:c4p]
    for dk in range(1, 5):                            # static, unrolled
        acc = acc + pltpu.roll(y[:, dk * c4p:(dk + 1) * c4p], shift=m - dk, axis=0)

    # bias + validity mask + ReLU, then max-pool over the full padded time axis.
    # Invalid positions become exactly 0 after ReLU and can never beat the max of
    # the valid (>= 0) rows, so the pooled result matches the reference.
    act = jnp.maximum(acc.reshape(tb, lp, c4p) + bm_ref[...], 0.0)
    pooled = jnp.max(act, axis=1)                     # [tb, c4p]

    # Single lane-dense fc matmul on the concatenated pooled features.
    out = jnp.dot(pooled.astype(wfc_ref.dtype), wfc_ref[...],
                  preferred_element_type=jnp.float32) + bfc_ref[...]
    out_ref[...] = out.astype(out_ref.dtype)


def my_cnn_forward(tokens, params, *, compute_dtype=jnp.bfloat16, block_b=None):
    """tokens: int32 [B, L]; returns float32 [B, typenum]."""
    emb = params["embedding"]                         # [V, D]
    B, L = tokens.shape
    V, D = emb.shape
    C = params["w1"].shape[2]                         # channels per branch ("longest")
    typenum = params["wfc"].shape[1]

    # Unified conv-output time axis: position s covers padded window [s, s+5).
    S = L + 2                                         # union of the 4 branch out_lens
    S_pad = ((S + 7) // 8) * 8
    Lp = S_pad + 8                                    # multiple of 8, >= S + 5 roll slack
    C4p = ((4 * C + 127) // 128) * 128                # lane-aligned pooled width
    OUTp = ((typenum + 127) // 128) * 128             # lane-dense fc output width
    itemsize = jnp.dtype(compute_dtype).itemsize

    # ---- VMEM-aware batch-block sizing (f32 intermediates included) ----
    try:
        vmem_cap = int(pltpu.get_tpu_info().vmem_capacity_bytes)
    except Exception:
        vmem_cap = 64 * 1024 * 1024                   # v7x-sized conservative fallback
    vmem_limit = min(96 * 1024 * 1024, (vmem_cap * 3) // 4)   # 48 MiB on v7x, 96 on v5e/v6e

    per_row = (2 * Lp * D * itemsize                  # x tile (double buffered)
               + Lp * 5 * C4p * 4                     # y  (f32 matmul output)
               + 3 * Lp * C4p * 4)                    # acc / rolled temp / act
    const_bytes = 2 * (D * 5 * C4p * itemsize         # w_all      (x2: pipeline buffers)
                       + Lp * C4p * 4                 # bias/mask
                       + C4p * OUTp * itemsize        # fc weight
                       + OUTp * 4)                    # fc bias
    budget = max(per_row * 8, (vmem_limit * 7) // 10 - const_bytes)

    if block_b is None:
        block_b = max(8, min(512, ((budget // per_row) // 8) * 8))
    block_b = max(8, min(block_b, ((B + 7) // 8) * 8))
    if B > 8:                                         # keep >= 2 grid steps (2 TCs on v7x)
        block_b = min(block_b, max(8, ((pl.cdiv(B, 2) + 7) // 8) * 8))
    n_steps = pl.cdiv(B, block_b)
    if n_steps > 1 and n_steps % 2 == 1:              # even split across v7x TensorCores
        n_steps += 1
    block_b = max(8, ((pl.cdiv(B, n_steps) + 7) // 8) * 8)
    B_pad = n_steps * block_b

    # ---- wrapper-side parameter packing ----
    ks_pads = ((2, 1), (3, 1), (4, 2), (5, 2))        # (kernel, padding) per branch

    # Conv weights: w_all[d, dk*C4p + i*C + c] = w{i+1}[dk, d, c], zero elsewhere.
    w_all = jnp.zeros((5, D, C4p), jnp.float32)
    for i, (k, _) in enumerate(ks_pads):
        w_all = w_all.at[:k, :, i * C:(i + 1) * C].set(params[f"w{i + 1}"])
    w_all = jnp.transpose(w_all, (1, 0, 2)).reshape(D, 5 * C4p).astype(compute_dtype)

    # Per-position bias / validity mask [Lp, C4p]: branch i's output t lives at
    # s = (2 - pad_i) + t; everything else (and the padded channels) gets -1e30.
    s_idx = jnp.arange(Lp)[:, None]
    bm = jnp.full((Lp, C4p), -1e30, jnp.float32)
    for i, (k, pad) in enumerate(ks_pads):
        start = 2 - pad
        out_len = L + 2 * pad - k + 1
        valid = (s_idx >= start) & (s_idx < start + out_len)
        bm = bm.at[:, i * C:(i + 1) * C].set(
            jnp.where(valid, params[f"b{i + 1}"], jnp.float32(-1e30)))

    # fc weight / bias zero-padded to lane-dense widths.
    wfc = jnp.zeros((C4p, OUTp), jnp.float32).at[:4 * C, :typenum].set(
        params["wfc"]).astype(compute_dtype)
    bfc = jnp.zeros((1, OUTp), jnp.float32).at[:, :typenum].set(params["bfc"])

    # Embedding gather straight into the padded compute-dtype layout: a zero row is
    # appended to the table and padded token ids (= V) index it, so batch/time
    # padding falls out of the single gather (dropout = inference identity).
    emb_c = jnp.concatenate(
        [emb.astype(compute_dtype), jnp.zeros((1, D), compute_dtype)], axis=0)
    tok_pad = jnp.full((B_pad, Lp), V, jnp.int32).at[:B, 2:2 + L].set(tokens)
    xp = jnp.take(emb_c, tok_pad, axis=0)             # [B_pad, Lp, D]

    kernel = functools.partial(_cnn_kernel, lp=Lp, c4p=C4p)
    out_padded = pl.pallas_call(
        kernel,
        out_shape=jax.ShapeDtypeStruct((B_pad, OUTp), jnp.float32),
        grid_spec=pltpu.PrefetchScalarGridSpec(
            num_scalar_prefetch=0,
            grid=(B_pad // block_b,),
            in_specs=[
                pl.BlockSpec((block_b, Lp, D), lambda b: (b, 0, 0)),
                # Constant-index operands: fetched once (block index never changes).
                pl.BlockSpec((D, 5 * C4p), lambda b: (0, 0)),
                pl.BlockSpec((Lp, C4p), lambda b: (0, 0)),
                pl.BlockSpec((C4p, OUTp), lambda b: (0, 0)),
                pl.BlockSpec((1, OUTp), lambda b: (0, 0)),
            ],
            out_specs=pl.BlockSpec((block_b, OUTp), lambda b: (b, 0)),
        ),
        compiler_params=pltpu.CompilerParams(
            dimension_semantics=("parallel",),
            vmem_limit_bytes=int(vmem_limit)),
    )(xp, w_all, bm, wfc, bfc)
    return out_padded[:B, :typenum]


def init_params(key, len_feature, len_words, longest, typenum=5):
    ks = jax.random.split(key, 11)
    std_emb = (2.0 / (len_words + len_feature)) ** 0.5      # xavier_normal_
    params = {
        "embedding": std_emb * jax.random.normal(
            ks[0], (len_words, len_feature), jnp.float32),
        "wfc": 0.1 * jax.random.normal(
            ks[9], (4 * longest, typenum), jnp.float32),
        "bfc": 0.01 * jax.random.normal(ks[10], (1, typenum), jnp.float32),
    }
    for i, k in enumerate((2, 3, 4, 5), start=1):
        params[f"w{i}"] = 0.1 * jax.random.normal(
            ks[2 * i - 1], (k, len_feature, longest), jnp.float32)
        params[f"b{i}"] = 0.01 * jax.random.normal(
            ks[2 * i], (1, longest), jnp.float32)
    return params


def reference_forward(tokens, params):
    """Pure-JAX reference matching the PyTorch forward (inference mode)."""
    emb = params["embedding"]
    xe = jnp.take(emb, tokens, axis=0)
    B, L, D = xe.shape
    xp = jnp.pad(xe, ((0, 0), (2, 2), (0, 0)))

    def branch(w, b, k, pad):
        out_len = L + 2 * pad - k + 1
        start = 2 - pad
        acc = jnp.zeros((B, out_len, w.shape[2]), jnp.float32) + b
        for dk in range(k):
            acc = acc + jnp.einsum(
                "btd,dc->btc", xp[:, start + dk:start + dk + out_len, :], w[dk],
                precision=jax.lax.Precision.HIGHEST)
        return jnp.max(jnp.maximum(acc, 0.0), axis=1)

    pool = jnp.concatenate([
        branch(params["w1"], params["b1"], 2, 1),
        branch(params["w2"], params["b2"], 3, 1),
        branch(params["w3"], params["b3"], 4, 2),
        branch(params["w4"], params["b4"], 5, 2)], axis=1)
    return jnp.dot(pool, params["wfc"],
                   precision=jax.lax.Precision.HIGHEST) + params["bfc"]


if __name__ == "__main__":
    len_feature, len_words, longest, typenum = 32, 64, 8, 5
    batch, seq = 4, 8

    key = jax.random.PRNGKey(0)
    kp, kx = jax.random.split(key)
    params = init_params(kp, len_feature, len_words, longest, typenum)
    tokens = jax.random.randint(kx, (batch, seq), 0, len_words, dtype=jnp.int32)

    ref = reference_forward(tokens, params)

    # f32 compute path: tight semantic check against the pure-JAX reference.
    out_f32 = my_cnn_forward(tokens, params, compute_dtype=jnp.float32)
    jax.block_until_ready(out_f32)
    assert out_f32.shape == (batch, typenum), out_f32.shape
    assert jnp.allclose(out_f32, ref, atol=2e-4, rtol=2e-4), (out_f32, ref)

    # Default bf16 fast path (f32 accumulation): looser tolerance smoke check.
    out_bf16 = my_cnn_forward(tokens, params)
    jax.block_until_ready(out_bf16)
    assert out_bf16.shape == (batch, typenum), out_bf16.shape
    assert jnp.allclose(out_bf16, ref, atol=5e-2, rtol=1e-1), (out_bf16, ref)

    print("KERNEL_OK")
</pallas_src>

<mosaic_0001>
module attributes {stable_mosaic.version = 11 : i64} {
  func.func @_cnn_kernel(%arg0: i32, %arg1: memref<8x24x32xf32, #tpu.memory_space<vmem>>, %arg2: memref<32x640xf32, #tpu.memory_space<vmem>>, %arg3: memref<24x128xf32, #tpu.memory_space<vmem>>, %arg4: memref<128x128xf32, #tpu.memory_space<vmem>>, %arg5: memref<1x128xf32, #tpu.memory_space<vmem>>, %arg6: memref<8x128xf32, #tpu.memory_space<vmem>>) attributes {dimension_semantics = [#tpu.dimension_semantics<parallel>], iteration_bounds = array<i64: 1>, scalar_prefetch = 0 : i64, scratch_operands = 0 : i64, tpu.core_type = #tpu.core_type<tc>, window_params = [{transform_indices = @transform_0, window_bounds = array<i64: 8, 24, 32>}, {pipeline_mode = #tpu.pipeline_mode<synchronous>, transform_indices = @transform_1, window_bounds = array<i64: 32, 640>}, {pipeline_mode = #tpu.pipeline_mode<synchronous>, transform_indices = @transform_2, window_bounds = array<i64: 24, 128>}, {pipeline_mode = #tpu.pipeline_mode<synchronous>, transform_indices = @transform_3, window_bounds = array<i64: 128, 128>}, {pipeline_mode = #tpu.pipeline_mode<synchronous>, transform_indices = @transform_4, window_bounds = array<i64: 1, 128>}, {transform_indices = @transform_5, window_bounds = array<i64: 8, 128>}]} {
    %c0 = arith.constant 0 : index
    %c0_0 = arith.constant 0 : index
    %c0_1 = arith.constant 0 : index
    %0 = vector.load %arg1[%c0, %c0_0, %c0_1] : memref<8x24x32xf32, #tpu.memory_space<vmem>>, vector<8x24x32xf32>
    %1 = vector.shape_cast %0 : vector<8x24x32xf32> to vector<192x32xf32>
    %c0_2 = arith.constant 0 : index
    %c0_3 = arith.constant 0 : index
    %2 = vector.load %arg2[%c0_2, %c0_3] : memref<32x640xf32, #tpu.memory_space<vmem>>, vector<32x640xf32>
    %cst = arith.constant dense<0.000000e+00> : vector<192x640xf32>
    %3 = tpu.matmul %1, %2, %cst {dimension_numbers = #tpu.dot_dimension_numbers<[1], [0], [0], [1], [0, 0, 1, 1], [], []>} : vector<192x32xf32>, vector<32x640xf32>, vector<192x640xf32> -> vector<192x640xf32>
    %4 = vector.extract_strided_slice %3 {offsets = [0, 0], sizes = [192, 128], strides = [1, 1]} : vector<192x640xf32> to vector<192x128xf32>
    %5 = vector.extract_strided_slice %3 {offsets = [0, 128], sizes = [192, 128], strides = [1, 1]} : vector<192x640xf32> to vector<192x128xf32>
    %c191_i32 = arith.constant 191 : i32
    %6 = tpu.dynamic_rotate %5 by %c191_i32 dim 0 : vector<192x128xf32>, i32 -> vector<192x128xf32>
    %7 = arith.addf %4, %6 : vector<192x128xf32>
    %8 = vector.extract_strided_slice %3 {offsets = [0, 256], sizes = [192, 128], strides = [1, 1]} : vector<192x640xf32> to vector<192x128xf32>
    %c190_i32 = arith.constant 190 : i32
    %9 = tpu.dynamic_rotate %8 by %c190_i32 dim 0 : vector<192x128xf32>, i32 -> vector<192x128xf32>
    %10 = arith.addf %7, %9 : vector<192x128xf32>
    %11 = vector.extract_strided_slice %3 {offsets = [0, 384], sizes = [192, 128], strides = [1, 1]} : vector<192x640xf32> to vector<192x128xf32>
    %c189_i32 = arith.constant 189 : i32
    %12 = tpu.dynamic_rotate %11 by %c189_i32 dim 0 : vector<192x128xf32>, i32 -> vector<192x128xf32>
    %13 = arith.addf %10, %12 : vector<192x128xf32>
    %14 = vector.extract_strided_slice %3 {offsets = [0, 512], sizes = [192, 128], strides = [1, 1]} : vector<192x640xf32> to vector<192x128xf32>
    %c188_i32 = arith.constant 188 : i32
    %15 = tpu.dynamic_rotate %14 by %c188_i32 dim 0 : vector<192x128xf32>, i32 -> vector<192x128xf32>
    %16 = arith.addf %13, %15 : vector<192x128xf32>
    %17 = vector.shape_cast %16 : vector<192x128xf32> to vector<8x24x128xf32>
    %c0_4 = arith.constant 0 : index
    %c0_5 = arith.constant 0 : index
    %18 = vector.load %arg3[%c0_4, %c0_5] : memref<24x128xf32, #tpu.memory_space<vmem>>, vector<24x128xf32>
    %19 = vector.shape_cast %18 : vector<24x128xf32> to vector<1x24x128xf32>
    %20 = vector.broadcast %19 : vector<1x24x128xf32> to vector<8x24x128xf32>
    %21 = arith.addf %17, %20 : vector<8x24x128xf32>
    %cst_6 = arith.constant 0.000000e+00 : f32
    %22 = vector.broadcast %cst_6 : f32 to vector<8x24x128xf32>
    %23 = arith.maximumf %21, %22 : vector<8x24x128xf32>
    %cst_7 = arith.constant dense<0xFF800000> : vector<8x128xf32>
    %24 = vector.multi_reduction <maximumf>, %23, %cst_7 [1] : vector<8x24x128xf32> to vector<8x128xf32>
    %c0_8 = arith.constant 0 : index
    %c0_9 = arith.constant 0 : index
    %25 = vector.load %arg4[%c0_8, %c0_9] : memref<128x128xf32, #tpu.memory_space<vmem>>, vector<128x128xf32>
    %cst_10 = arith.constant dense<0.000000e+00> : vector<8x128xf32>
    %26 = tpu.matmul %24, %25, %cst_10 {dimension_numbers = #tpu.dot_dimension_numbers<[1], [0], [0], [1], [0, 0, 1, 1], [], []>} : vector<8x128xf32>, vector<128x128xf32>, vector<8x128xf32> -> vector<8x128xf32>
    %c0_11 = arith.constant 0 : index
    %c0_12 = arith.constant 0 : index
    %27 = vector.load %arg5[%c0_11, %c0_12] : memref<1x128xf32, #tpu.memory_space<vmem>>, vector<1x128xf32>
    %28 = vector.broadcast %27 : vector<1x128xf32> to vector<8x128xf32>
    %29 = arith.addf %26, %28 : vector<8x128xf32>
    %c0_13 = arith.constant 0 : index
    %c0_14 = arith.constant 0 : index
    %30 = vector.load %arg6[%c0_13, %c0_14] : memref<8x128xf32, #tpu.memory_space<vmem>>, vector<8x128xf32>
    tpu.vector_store %arg6[%c0_13, %c0_14], %29 {strides = array<i32>} : memref<8x128xf32, #tpu.memory_space<vmem>>, vector<8x128xf32>,
    return
  }
  func.func @transform_0(%arg0: i32) -> (i32, i32, i32) {
    %c0_i32 = arith.constant 0 : i32
    %c0_i32_0 = arith.constant 0 : i32
    %c0_i32_1 = arith.constant 0 : i32
    return %arg0, %c0_i32, %c0_i32_0 : i32, i32, i32
  }
  func.func @transform_1(%arg0: i32) -> (i32, i32) {
    %c0_i32 = arith.constant 0 : i32
    %c0_i32_0 = arith.constant 0 : i32
    %c0_i32_1 = arith.constant 0 : i32
    return %c0_i32, %c0_i32_0 : i32, i32
  }
  func.func @transform_2(%arg0: i32) -> (i32, i32) {
    %c0_i32 = arith.constant 0 : i32
    %c0_i32_0 = arith.constant 0 : i32
    %c0_i32_1 = arith.constant 0 : i32
    return %c0_i32, %c0_i32_0 : i32, i32
  }
  func.func @transform_3(%arg0: i32) -> (i32, i32) {
    %c0_i32 = arith.constant 0 : i32
    %c0_i32_0 = arith.constant 0 : i32
    %c0_i32_1 = arith.constant 0 : i32
    return %c0_i32, %c0_i32_0 : i32, i32
  }
  func.func @transform_4(%arg0: i32) -> (i32, i32) {
    %c0_i32 = arith.constant 0 : i32
    %c0_i32_0 = arith.constant 0 : i32
    %c0_i32_1 = arith.constant 0 : i32
    return %c0_i32, %c0_i32_0 : i32, i32
  }
  func.func @transform_5(%arg0: i32) -> (i32, i32) {
    %c0_i32 = arith.constant 0 : i32
    %c0_i32_0 = arith.constant 0 : i32
    return %arg0, %c0_i32 : i32, i32
  }
}

</mosaic_0001>

<bundles_post_ra>
// kernel: tpu_custom_call.1
= control target key start
LH: loop header
LB: loop body
LE: loop exit
PB: predicated region body
PF: predicated region fallthrough
CT: control target
= control target key end

     0   :  { %10 = vsyncpa [#allocation3], 0  ;;  %s2380_s0 = inlined_call_operand.hbm [shape: f32[8,24,32], index: 0, kind: input, shape index: {}]   ;;  %s2381_s1 = inlined_call_operand.hbm [shape: f32[32,640], index: 1, kind: input, shape index: {}]   ;;  %s2382_s2 = inlined_call_operand.hbm [shape: f32[24,128], index: 2, kind: input, shape index: {}]   ;;  %s2383_s3 = inlined_call_operand.hbm [shape: f32[128,128], index: 3, kind: input, shape index: {}]   ;;  %s2384_s4 = inlined_call_operand.vmem [shape: f32[1,128], index: 4, kind: input, shape index: {}]   ;;  %s2385_s5 = inlined_call_operand.hbm [shape: f32[8,128], index: 5, kind: output, shape index: {}]  }
   0x1   :  { %11 = vsyncpa [#allocation6], 0 }
   0x2   :  { %12 = vsyncpa [#allocation9], 0 }
   0x3   :  { %13 = vsyncpa [#allocation4], 0  ;;  %s1663_s18 = smov [#allocation5]  }
   0x4   :  { %s31_s19 = sshll.u32 %s1663_s18, 4  ;;  %s32_s19 = int_to_ptr.vmem [resolvable:$true] %s31_s19 }
   0x5   :  { %s1563_s20 = scalar_lea.vmem %s32_s19, 2560  ;;  %p1568_p1 = scmp.lt.s32.totalorder %s32_s19, %s32_s19 }
   0x6   :  { %p1564_p0 = scmp.ne.s32.totalorder %s32_s19, %s1563_s20  ;;  %p1569_p2 = scmp.lt.s32.totalorder %s1563_s20, %s1563_s20 }
   0x8   :  { %p1570_p3 = por %p1569_p2, %p1568_p1 }
   0xa   :  { %p1571_p4 = pnand %p1570_p3, %p1564_p0 }
   0xc   :  { %1574 = shalt.err (!%p1571_p4)
}
   0xd   :  { %s1664_s21 = smov 640   ;;  %s1665_s22 = smov 40  }
   0xe   :  { %37 = dma.hbm_to_vmem [thread:$0]  %s2381_s1, 2560, %s32_s19, [#allocation6], %s1664_s21, %s1664_s21, %s1665_s22  }
   0xf   :  { %s1666_s25 = smov [#allocation2]  }
  0x10   :  { %s19_s26 = sshll.u32 %s1666_s25, 4  ;;  %s20_s26 = int_to_ptr.vmem [resolvable:$true] %s19_s26 }
  0x11   :  { %s1583_s27 = scalar_lea.vmem %s20_s26, 3072  ;;  %p1588_p6 = scmp.lt.s32.totalorder %s20_s26, %s20_s26 }
  0x12   :  { %p1584_p5 = scmp.ne.s32.totalorder %s20_s26, %s1583_s27  ;;  %p1589_p7 = scmp.lt.s32.totalorder %s1583_s27, %s1583_s27 }
  0x14   :  { %p1590_p8 = por %p1589_p7, %p1588_p6 }
  0x16   :  { %p1591_p9 = pnand %p1590_p8, %p1584_p5 }
  0x18   :  { %1594 = shalt.err (!%p1591_p9)
}
  0x19   :  { %s1667_s28 = smov 128   ;;  %s1668_s29 = smov 8  }
  0x1a   :  { %25 = dma.hbm_to_vmem [thread:$0]  %s2380_s0, 3072, %s20_s26, [#allocation3], %s1667_s28, %s1667_s28, %s1668_s29  }
  0x1b   :  { %s1669_s7 = smov [#allocation7]   ;;  %s1670_s9 = smov [#allocation8]  }
  0x1c   :  { %s43_s8 = sshll.u32 %s1669_s7, 4  ;;  %s55_s1 = sshll.u32 %s1670_s9, 4  ;;  %s44_s8 = int_to_ptr.vmem [resolvable:$true] %s43_s8  ;;  %s56_s1 = int_to_ptr.vmem [resolvable:$true] %s55_s1 }
  0x1d   :  { %s1603_s10 = scalar_lea.vmem %s44_s8, 384  ;;  %p1608_p11 = scmp.lt.s32.totalorder %s44_s8, %s44_s8 }
  0x1e   :  { %p1604_p10 = scmp.ne.s32.totalorder %s44_s8, %s1603_s10  ;;  %p1609_p12 = scmp.lt.s32.totalorder %s1603_s10, %s1603_s10 }
  0x20   :  { %p1610_p13 = por %p1609_p12, %p1608_p11 }
  0x22   :  { %p1611_p0 = pnand %p1610_p13, %p1604_p10 }
  0x24   :  { %1614 = shalt.err (!%p1611_p0)
}
  0x25   :  { %49 = dma.hbm_to_vmem [thread:$0]  %s2382_s2, 384, %s44_s8, [#allocation6], %s1667_s28, %s1667_s28, %s1668_s29  }
  0x26   :  { %s1623_s13 = scalar_lea.vmem %s56_s1, 2048  ;;  %p1628_p2 = scmp.lt.s32.totalorder %s56_s1, %s56_s1 }
  0x27   :  { %p1624_p1 = scmp.ne.s32.totalorder %s56_s1, %s1623_s13  ;;  %p1629_p3 = scmp.lt.s32.totalorder %s1623_s13, %s1623_s13 }
  0x29   :  { %p1630_p4 = por %p1629_p3, %p1628_p2 }
  0x2b   :  { %p1631_p5 = pnand %p1630_p4, %p1624_p1 }
  0x2d   :  { %1634 = shalt.err (!%p1631_p5)
}
  0x2e   :  { %61 = dma.hbm_to_vmem [thread:$0]  %s2383_s3, 2048, %s56_s1, [#allocation9], %s1667_s28, %s1667_s28, %s1668_s29  }
  0x2f   :  { %1655 = dma.done.wait [#allocation3], 3072  }
  0x30   :  { %1656 = vsyncadd [#allocation3], 4294964224 }
  0x31   :  { %1657 = dma.done.wait [#allocation6], 2944  }
  0x32   :  { %1658 = vsyncadd [#allocation6], 4294964352 }
  0x33   :  { %1659 = dma.done.wait [#allocation9], 2048  }
  0x34   :  { %1660 = vsyncadd [#allocation9], 4294965248  ;;  %v1671_v0 = vmov 0.0   ;;  %v116_v1 = vld [vmem:[#allocation5 + $0x80] sm:$0xff]  ;;  %v115_v2 = vld [vmem:[#allocation5 + $0x78] sm:$0xff]  ;;  %vm120_vm0 = vcmask 261120   ;;  %v820_v53 = vlaneseq }
  0x35   :  { %257 = vmatprep.mubr.f32.mxu0 %v1671_v0  ;;  %371 = vmatprep.mubr.f32.mxu1 %v1671_v0  ;;  %v111_v3 = vld [vmem:[#allocation5 + $0x58] sm:$0xff]  ;;  %v110_v4 = vld [vmem:[#allocation5 + $0x50] sm:$0xff]  ;;  %v105_v6 = vld [vmem:[#allocation5 + $0x28] sm:$0xff]  ;;  %vm1672_vm2 = vmmov 0   ;;  %vm1236_vm6 = vcmask 1041409   ;;  %vm1238_vm7 = vcmask 1042434  }
  0x36   :  { %217 = vmatprep.subr.mxu0 %v116_v1  ;;  %1536 = vmatprep.subr.mxu1 %v116_v1  ;;  %v106_v5 = vld [vmem:[#allocation5 + $0x30] sm:$0xff]  ;;  %v101_v7 = vld [vmem:[#allocation5 + $0x8] sm:$0xff]  ;;  %v100_v8 = vld [vmem:[#allocation5] sm:$0xff]  ;;  %v1927_v58 = vshrl.u32 %v820_v53, 7  ;;  %vm1240_vm8 = vcmask 1043459   ;;  %vm1242_vm9 = vcmask 1044484  }
  0x37   :  { %218 = vmatpush1.msra.mxu0 %v115_v2  ;;  %1540 = vmatpush1.msra.mxu1 %v115_v2  ;;  %v1718_v9 = vld [vmem:[#allocation2] sm:$0xff]  ;;  %v1720_v10 = vld [vmem:[#allocation2 + $0x98] sm:$0xff]  ;;  %v118_v12 = vld [vmem:[#allocation5 + $0x90] sm:$0xff]  ;;  %vm1244_vm10 = vcmask 1045509   ;;  %vm1246_vm11 = vcmask 1046534   ;;  %vm1248_vm12 = vcmask 1047559  }
  0x38   :  { %219 = vmatprep.subr.mxu0 %v111_v3  ;;  %1537 = vmatprep.subr.mxu1 %v111_v3  ;;  %v119_v11 = vld [vmem:[#allocation5 + $0x98] sm:$0xff]  ;;  %v114_v13 = vld [vmem:[#allocation5 + $0x70] sm:$0xff]  ;;  %v1727_v14 = vld [vmem:[#allocation2 + $0x8] sm:$0xff]  ;;  %vm822_vm1 = vcmp.lt.s32.totalorder %v1927_v58, 7  ;;  %vm895_vm3 = vcmp.lt.s32.totalorder %v1927_v58, 6  ;;  %vm968_vm4 = vcmp.lt.s32.totalorder %v1927_v58, 5 }
  0x39   :  { %220 = vmatpush1.msra.mxu0 %v110_v4  ;;  %1541 = vmatpush1.msra.mxu1 %v110_v4  ;;  %v1729_v15 = vld [vmem:[#allocation2 + $0xa0] sm:$0xff]  ;;  %v117_v16 = vld [vmem:[#allocation5 + $0x88] sm:$0xff]  ;;  %v1738_v19 = vld [vmem:[#allocation2 + $0x10] sm:$0xff]  ;;  %vm1041_vm5 = vcmp.lt.s32.totalorder %v1927_v58, 4  ;;  %s1673_s15 = smov [#allocation10]  }
  0x3a   :  { %221 = vmatprep.subr.mxu0 %v106_v5  ;;  %1538 = vmatprep.subr.mxu1 %v106_v5  ;;  %v113_v17 = vld [vmem:[#allocation5 + $0x68] sm:$0xff]  ;;  %v112_v21 = vld [vmem:[#allocation5 + $0x60] sm:$0xff]  ;;  %v1748_v24 = vld [vmem:[#allocation2 + $0x18] sm:$0xff]  ;;  %s1328_s16 = sshll.u32 %s1673_s15, 4  ;;  %s1329_s16 = int_to_ptr.vmem [resolvable:$true] %s1328_s16 }
  0x3b   :  { %222 = vmatpush1.msra.mxu0 %v105_v6  ;;  %1542 = vmatpush1.msra.mxu1 %v105_v6  ;;  %v109_v18 = vld [vmem:[#allocation5 + $0x48] sm:$0xff]  ;;  %v108_v22 = vld [vmem:[#allocation5 + $0x40] sm:$0xff]  ;;  %v1750_v25 = vld [vmem:[#allocation2 + $0xb0] sm:$0xff]  ;;  %s1635_s17 = scalar_lea.vmem %s1329_s16, 128  ;;  %p1640_p7 = scmp.lt.s32.totalorder %s1329_s16, %s1329_s16 }
  0x3c   :  { %223 = vmatprep.subr.mxu0 %v101_v7  ;;  %1539 = vmatprep.subr.mxu1 %v101_v7  ;;  %v1740_v20 = vld [vmem:[#allocation2 + $0xa8] sm:$0xff]  ;;  %v104_v23 = vld [vmem:[#allocation5 + $0x20] sm:$0xff]  ;;  %v107_v26 = vld [vmem:[#allocation5 + $0x38] sm:$0xff]  ;;  %p1636_p6 = scmp.ne.s32.totalorder %s1329_s16, %s1635_s17  ;;  %p1641_p8 = scmp.lt.s32.totalorder %s1635_s17, %s1635_s17 }
  0x3d   :  { %224 = vmatpush1.msra.mxu0 %v100_v8  ;;  %1543 = vmatpush1.msra.mxu1 %v100_v8  ;;  %v103_v27 = vld [vmem:[#allocation5 + $0x18] sm:$0xff]  ;;  %v1758_v28 = vld [vmem:[#allocation2 + $0x20] sm:$0xff]  ;;  %v102_v30 = vld [vmem:[#allocation5 + $0x10] sm:$0xff] }
  0x3e   :  { %1339 = vmatmul.mubr.msk.f32.vlgmr.msra.gmra.mxu0 %vm120_vm0, %v1718_v9  ;;  %1358 = vmatmul.mubr.msk.f32.vlgmr.msra.gmra.mxu1 %vm120_vm0, %v1720_v10  ;;  %v1760_v29 = vld [vmem:[#allocation2 + $0xb8] sm:$0xff]  ;;  %v1767_v31 = vld [vmem:[#allocation2 + $0x28] sm:$0xff]  ;;  %v1777_v32 = vld [vmem:[#allocation2 + $0x30] sm:$0xff]  ;;  %p1642_p9 = por %p1641_p8, %p1640_p7 }
  0x3f   :  { %1457 = vmatprep.subr.mxu0 %v119_v11  ;;  %263 = vmatprep.mubr.f32.mxu0 %v1671_v0  ;;  %v1785_v33 = vld [vmem:[#allocation2 + $0x38] sm:$0xff]  ;;  %v1793_v34 = vld [vmem:[#allocation2 + $0x40] sm:$0xff]  ;;  %v1801_v35 = vld [vmem:[#allocation2 + $0x48] sm:$0xff] }
  0x40   :  { %1458 = vmatpush3.msra.mxu0 %v119_v11  ;;  %377 = vmatprep.mubr.f32.mxu1 %v1671_v0  ;;  %v1809_v36 = vld [vmem:[#allocation2 + $0x50] sm:$0xff]  ;;  %v87_v37 = vld [vmem:[#allocation2 + $0x58] sm:$0xff]  ;;  %v88_v38 = vld [vmem:[#allocation2 + $0x60] sm:$0xff]  ;;  %p1643_p10 = pnand %p1642_p9, %p1636_p6 }
  0x41   :  { %426 = vmatprep.subr.mxu1 %v118_v12  ;;  %1459 = vmatprep.subr.mxu0 %v114_v13  ;;  %v89_v39 = vld [vmem:[#allocation2 + $0x68] sm:$0xff]  ;;  %v90_v40 = vld [vmem:[#allocation2 + $0x70] sm:$0xff]  ;;  %v91_v41 = vld [vmem:[#allocation2 + $0x78] sm:$0xff] }
  0x42   :  { %1340 = vmatmul.mubr.msk.f32.gmra.mxu0 %vm120_vm0, %v1727_v14  ;;  %1359 = vmatmul.mubr.msk.f32.gmra.mxu1 %vm120_vm0, %v1729_v15  ;;  %v92_v42 = vld [vmem:[#allocation2 + $0x80] sm:$0xff]  ;;  %v93_v43 = vld [vmem:[#allocation2 + $0x88] sm:$0xff]  ;;  %v94_v44 = vld [vmem:[#allocation2 + $0x90] sm:$0xff] }
  0x43   :  { %269 = vmatprep.mubr.f32.mxu0 %v1671_v0  ;;  %383 = vmatprep.mubr.f32.mxu1 %v1671_v0  ;;  %v1220_v45 = vld [vmem:[#allocation8 + $0x78] sm:$0xff]  ;;  %v1219_v46 = vld [vmem:[#allocation8 + $0x70] sm:$0xff]  ;;  %v1218_v47 = vld [vmem:[#allocation8 + $0x68] sm:$0xff] }
  0x44   :  { %427 = vmatpush1.msra.mxu1 %v117_v16  ;;  %1460 = vmatpush3.msra.mxu0 %v114_v13  ;;  %v1217_v48 = vld [vmem:[#allocation8 + $0x60] sm:$0xff]  ;;  %v1216_v49 = vld [vmem:[#allocation8 + $0x58] sm:$0xff]  ;;  %v1215_v50 = vld [vmem:[#allocation8 + $0x50] sm:$0xff] }
  0x45   :  { %428 = vmatprep.subr.mxu1 %v113_v17  ;;  %1461 = vmatprep.subr.mxu0 %v109_v18  ;;  %v1214_v51 = vld [vmem:[#allocation8 + $0x48] sm:$0xff]  ;;  %v1213_v52 = vld [vmem:[#allocation8 + $0x40] sm:$0xff]  ;;  %v1212_v59 = vld [vmem:[#allocation8 + $0x38] sm:$0xff] }
  0x46   :  { %1341 = vmatmul.mubr.msk.f32.gmra.mxu0 %vm120_vm0, %v1738_v19  ;;  %1360 = vmatmul.mubr.msk.f32.gmra.mxu1 %vm120_vm0, %v1740_v20  ;;  %v1211_v7 = vld [vmem:[#allocation8 + $0x30] sm:$0xff] }
  0x47   :  { %275 = vmatprep.mubr.f32.mxu0 %v1671_v0  ;;  %389 = vmatprep.mubr.f32.mxu1 %v1671_v0 }
  0x48   :  { %429 = vmatpush1.msra.mxu1 %v112_v21  ;;  %1462 = vmatpush3.msra.mxu0 %v109_v18 }
  0x49   :  { %430 = vmatprep.subr.mxu1 %v108_v22  ;;  %1463 = vmatprep.subr.mxu0 %v104_v23 }
  0x4a   :  { %1342 = vmatmul.mubr.msk.f32.gmra.mxu0 %vm120_vm0, %v1748_v24  ;;  %1361 = vmatmul.mubr.msk.f32.gmra.mxu1 %vm120_vm0, %v1750_v25 }
  0x4b   :  { %281 = vmatprep.mubr.f32.mxu0 %v1671_v0  ;;  %395 = vmatprep.mubr.f32.mxu1 %v1671_v0 }
  0x4c   :  { %431 = vmatpush1.msra.mxu1 %v107_v26  ;;  %1464 = vmatpush3.msra.mxu0 %v104_v23 }
  0x4d   :  { %432 = vmatprep.subr.mxu1 %v103_v27 }
  0x4e   :  { %1343 = vmatmul.mubr.msk.f32.gmra.mxu0 %vm120_vm0, %v1758_v28  ;;  %1362 = vmatmul.mubr.msk.f32.gmra.mxu1 %vm120_vm0, %v1760_v29 }
  0x4f   :  { %287 = vmatprep.mubr.f32.mxu0 %v1671_v0  ;;  %433 = vmatpush1.msra.mxu1 %v102_v30 }
  0x50   :  { %466 = vmatprep.mubr.f32.mxu1 %v1671_v0  ;;  %1501 = vmatprep.subr.mxu1 %v1671_v0 }
  0x52   :  { %1344 = vmatmul.mubr.msk.f32.gmra.mxu0 %vm120_vm0, %v1767_v31  ;;  %1363 = vmatmul.mubr.msk.f32.vlgmr.msra.gmra.mxu1 %vm120_vm0, %v1718_v9 }
  0x53   :  { %293 = vmatprep.mubr.f32.mxu0 %v1671_v0  ;;  %472 = vmatprep.mubr.f32.mxu1 %v1671_v0 }
  0x54   :  { %1502 = vmatpush3.msra.mxu1 %v1220_v45 }
  0x55   :  { %1503 = vmatprep.subr.mxu1 %v1671_v0 }
  0x56   :  { %1345 = vmatmul.mubr.msk.f32.gmra.mxu0 %vm120_vm0, %v1777_v32  ;;  %1364 = vmatmul.mubr.msk.f32.gmra.mxu1 %vm120_vm0, %v1727_v14 }
  0x57   :  { %299 = vmatprep.mubr.f32.mxu0 %v1671_v0  ;;  %478 = vmatprep.mubr.f32.mxu1 %v1671_v0 }
  0x58   :  { %1504 = vmatpush3.msra.mxu1 %v1219_v46 }
  0x59   :  { %1505 = vmatprep.subr.mxu1 %v1671_v0 }
  0x5a   :  { %1346 = vmatmul.mubr.msk.f32.gmra.mxu0 %vm120_vm0, %v1785_v33  ;;  %1365 = vmatmul.mubr.msk.f32.gmra.mxu1 %vm120_vm0, %v1738_v19 }
  0x5b   :  { %305 = vmatprep.mubr.f32.mxu0 %v1671_v0  ;;  %484 = vmatprep.mubr.f32.mxu1 %v1671_v0 }
  0x5c   :  { %1506 = vmatpush3.msra.mxu1 %v1218_v47 }
  0x5d   :  { %1507 = vmatprep.subr.mxu1 %v1671_v0 }
  0x5e   :  { %1347 = vmatmul.mubr.msk.f32.gmra.mxu0 %vm120_vm0, %v1793_v34  ;;  %1366 = vmatmul.mubr.msk.f32.gmra.mxu1 %vm120_vm0, %v1748_v24 }
  0x5f   :  { %311 = vmatprep.mubr.f32.mxu0 %v1671_v0  ;;  %490 = vmatprep.mubr.f32.mxu1 %v1671_v0 }
  0x60   :  { %1508 = vmatpush3.msra.mxu1 %v1217_v48 }
  0x61   :  { %1509 = vmatprep.subr.mxu1 %v1671_v0 }
  0x62   :  { %1348 = vmatmul.mubr.msk.f32.gmra.mxu0 %vm120_vm0, %v1801_v35  ;;  %1367 = vmatmul.mubr.msk.f32.gmra.mxu1 %vm120_vm0, %v1758_v28 }
  0x63   :  { %317 = vmatprep.mubr.f32.mxu0 %v1671_v0  ;;  %496 = vmatprep.mubr.f32.mxu1 %v1671_v0 }
  0x64   :  { %1510 = vmatpush3.msra.mxu1 %v1216_v49  ;;  %v1207_v49 = vld [vmem:[#allocation8 + $0x10] sm:$0xff] }
  0x65   :  { %1511 = vmatprep.subr.mxu1 %v1671_v0 }
  0x66   :  { %1349 = vmatmul.mubr.msk.f32.gmra.mxu0 %vm120_vm0, %v1809_v36  ;;  %1368 = vmatmul.mubr.msk.f32.gmra.mxu1 %vm120_vm0, %v1767_v31 }
  0x67   :  { %323 = vmatprep.mubr.f32.mxu0 %v1671_v0  ;;  %502 = vmatprep.mubr.f32.mxu1 %v1671_v0 }
  0x68   :  { %1512 = vmatpush3.msra.mxu1 %v1215_v50 }
  0x69   :  { %1513 = vmatprep.subr.mxu1 %v1671_v0 }
  0x6a   :  { %1350 = vmatmul.mubr.msk.f32.gmra.mxu0 %vm120_vm0, %v87_v37  ;;  %1369 = vmatmul.mubr.msk.f32.gmra.mxu1 %vm120_vm0, %v1777_v32 }
  0x6b   :  { %329 = vmatprep.mubr.f32.mxu0 %v1671_v0  ;;  %508 = vmatprep.mubr.f32.mxu1 %v1671_v0 }
  0x6c   :  { %1514 = vmatpush3.msra.mxu1 %v1214_v51 }
  0x6d   :  { %1515 = vmatprep.subr.mxu1 %v1671_v0 }
  0x6e   :  { %1351 = vmatmul.mubr.msk.f32.gmra.mxu0 %vm120_vm0, %v88_v38  ;;  %1370 = vmatmul.mubr.msk.f32.gmra.mxu1 %vm120_vm0, %v1785_v33 }
  0x6f   :  { %335 = vmatprep.mubr.f32.mxu0 %v1671_v0  ;;  %514 = vmatprep.mubr.f32.mxu1 %v1671_v0 }
  0x70   :  { %1516 = vmatpush3.msra.mxu1 %v1213_v52 }
  0x71   :  { %1517 = vmatprep.subr.mxu1 %v1671_v0 }
  0x72   :  { %1352 = vmatmul.mubr.msk.f32.gmra.mxu0 %vm120_vm0, %v89_v39  ;;  %1371 = vmatmul.mubr.msk.f32.gmra.mxu1 %vm120_vm0, %v1793_v34 }
  0x73   :  { %341 = vmatprep.mubr.f32.mxu0 %v1671_v0  ;;  %520 = vmatprep.mubr.f32.mxu1 %v1671_v0 }
  0x74   :  { %1518 = vmatpush3.msra.mxu1 %v1212_v59 }
  0x75   :  { %1519 = vmatprep.subr.mxu1 %v1671_v0 }
  0x76   :  { %1353 = vmatmul.mubr.msk.f32.gmra.mxu0 %vm120_vm0, %v90_v40  ;;  %1372 = vmatmul.mubr.msk.f32.gmra.mxu1 %vm120_vm0, %v1801_v35 }
  0x77   :  { %347 = vmatprep.mubr.f32.mxu0 %v1671_v0  ;;  %526 = vmatprep.mubr.f32.mxu1 %v1671_v0 }
  0x78   :  { %1520 = vmatpush3.msra.mxu1 %v1211_v7 }
  0x79   :  { %1521 = vmatprep.subr.mxu1 %v1671_v0 }
  0x7a   :  { %1354 = vmatmul.mubr.msk.f32.gmra.mxu0 %vm120_vm0, %v91_v41  ;;  %1373 = vmatmul.mubr.msk.f32.gmra.mxu1 %vm120_vm0, %v1809_v36 }
  0x7b   :  { %353 = vmatprep.mubr.f32.mxu0 %v1671_v0  ;;  %532 = vmatprep.mubr.f32.mxu1 %v1671_v0 }
  0x7e   :  { %1355 = vmatmul.mubr.msk.f32.gmra.mxu0 %vm120_vm0, %v92_v42  ;;  %1374 = vmatmul.mubr.msk.f32.gmra.mxu1 %vm120_vm0, %v87_v37 }
  0x7f   :  { %359 = vmatprep.mubr.f32.mxu0 %v1671_v0  ;;  %538 = vmatprep.mubr.f32.mxu1 %v1671_v0 }
  0x82   :  { %1356 = vmatmul.mubr.msk.f32.gmra.mxu0 %vm120_vm0, %v93_v43  ;;  %1375 = vmatmul.mubr.msk.f32.gmra.mxu1 %vm120_vm0, %v88_v38 }
  0x83   :  { %365 = vmatprep.mubr.f32.mxu0 %v1671_v0  ;;  %544 = vmatprep.mubr.f32.mxu1 %v1671_v0 }
  0x86   :  { %1357 = vmatmul.mubr.msk.f32.gmra.mxu0 %vm120_vm0, %v94_v44  ;;  %1376 = vmatmul.mubr.msk.f32.gmra.mxu1 %vm120_vm0, %v89_v39 }
  0x87   :  { %550 = vmatprep.mubr.f32.mxu1 %v1671_v0  ;;  %1465 = vmatprep.mubr.msk.f32.mxu0 %vm120_vm0, %v1718_v9 }
  0x8a   :  { %1377 = vmatmul.mubr.msk.f32.gmra.mxu1 %vm120_vm0, %v90_v40  ;;  %1466 = vmatmul.mubr.msk.f32.vlgmr.msra.gmra.mxu0 %vm120_vm0, %v1727_v14 }
  0x8b   :  { %556 = vmatprep.mubr.f32.mxu1 %v1671_v0  ;;  %1468 = vmatprep.mubr.msk.f32.mxu0 %vm120_vm0, %v1738_v19 }
  0x8e   :  { %1378 = vmatmul.mubr.msk.f32.gmra.mxu1 %vm120_vm0, %v91_v41  ;;  %1469 = vmatmul.mubr.msk.f32.gmra.mxu0 %vm120_vm0, %v1748_v24 }
  0x8f   :  { %562 = vmatprep.mubr.f32.mxu1 %v1671_v0  ;;  %1471 = vmatprep.mubr.msk.f32.mxu0 %vm120_vm0, %v1758_v28 }
  0x92   :  { %1379 = vmatmul.mubr.msk.f32.gmra.mxu1 %vm120_vm0, %v92_v42  ;;  %1472 = vmatmul.mubr.msk.f32.gmra.mxu0 %vm120_vm0, %v1767_v31 }
  0x93   :  { %568 = vmatprep.mubr.f32.mxu1 %v1671_v0  ;;  %1474 = vmatprep.mubr.msk.f32.mxu0 %vm120_vm0, %v1777_v32 }
  0x96   :  { %1380 = vmatmul.mubr.msk.f32.gmra.mxu1 %vm120_vm0, %v93_v43  ;;  %1475 = vmatmul.mubr.msk.f32.gmra.mxu0 %vm120_vm0, %v1785_v33 }
  0x97   :  { %574 = vmatprep.mubr.f32.mxu1 %v1671_v0  ;;  %1477 = vmatprep.mubr.msk.f32.mxu0 %vm120_vm0, %v1793_v34  ;;  %v1210_v34 = vld [vmem:[#allocation8 + $0x28] sm:$0xff] }
  0x98   :  { %1522 = vmatpush3.msra.mxu1 %v1210_v34 }
  0x99   :  { %1523 = vmatprep.subr.mxu1 %v1671_v0 }
  0x9a   :  { %1381 = vmatmul.mubr.msk.f32.gmra.mxu1 %vm120_vm0, %v94_v44  ;;  %1478 = vmatmul.mubr.msk.f32.gmra.mxu0 %vm120_vm0, %v1801_v35  ;;  %v1209_v35 = vld [vmem:[#allocation8 + $0x20] sm:$0xff] }
  0x9b   :  { %580 = vmatprep.mubr.f32.mxu1 %v1671_v0  ;;  %1480 = vmatprep.mubr.msk.f32.mxu0 %vm120_vm0, %v1809_v36 }
  0x9c   :  { %1524 = vmatpush3.msra.mxu1 %v1209_v35 }
  0x9d   :  { %1525 = vmatprep.subr.mxu1 %v1671_v0 }
  0x9e   :  { %1382 = vmatmul.mubr.msk.f32.gmra.mxu1 %vm120_vm0, %v1720_v10  ;;  %1481 = vmatmul.mubr.msk.f32.gmra.mxu0 %vm120_vm0, %v87_v37 }
  0x9f   :  { %586 = vmatprep.mubr.f32.mxu1 %v1671_v0  ;;  %1483 = vmatprep.mubr.msk.f32.mxu0 %vm120_vm0, %v88_v38 }
  0xa2   :  { %1383 = vmatmul.mubr.msk.f32.gmra.mxu1 %vm120_vm0, %v1729_v15  ;;  %1484 = vmatmul.mubr.msk.f32.gmra.mxu0 %vm120_vm0, %v89_v39 }
  0xa3   :  { %592 = vmatprep.mubr.f32.mxu1 %v1671_v0  ;;  %1486 = vmatprep.mubr.msk.f32.mxu0 %vm120_vm0, %v90_v40  ;;  %v1208_v40 = vld [vmem:[#allocation8 + $0x18] sm:$0xff] }
  0xa4   :  { %1526 = vmatpush3.msra.mxu1 %v1208_v40 }
  0xa5   :  { %1527 = vmatprep.subr.mxu1 %v1671_v0 }
  0xa6   :  { %1384 = vmatmul.mubr.msk.f32.gmra.mxu1 %vm120_vm0, %v1740_v20  ;;  %1487 = vmatmul.mubr.msk.f32.gmra.mxu0 %vm120_vm0, %v91_v41 }
  0xa7   :  { %598 = vmatprep.mubr.f32.mxu1 %v1671_v0  ;;  %1489 = vmatprep.mubr.msk.f32.mxu0 %vm120_vm0, %v92_v42 }
  0xa8   :  { %1528 = vmatpush3.msra.mxu1 %v1207_v49 }
  0xa9   :  { %1529 = vmatprep.subr.mxu1 %v1671_v0 }
  0xaa   :  { %1385 = vmatmul.mubr.msk.f32.gmra.mxu1 %vm120_vm0, %v1750_v25  ;;  %1490 = vmatmul.mubr.msk.f32.gmra.mxu0 %vm120_vm0, %v93_v43 }
  0xab   :  { %604 = vmatprep.mubr.f32.mxu1 %v1671_v0  ;;  %1492 = vmatprep.mubr.msk.f32.mxu0 %vm120_vm0, %v94_v44 }
  0xae   :  { %1386 = vmatmul.mubr.msk.f32.gmra.mxu1 %vm120_vm0, %v1760_v29  ;;  %1493 = vmatmul.mubr.msk.f32.gmra.mxu0 %vm120_vm0, %v1720_v10 }
  0xaf   :  { %1495 = vmatprep.mubr.msk.f32.mxu0 %vm120_vm0, %v1729_v15  ;;  %1533 = vmatprep.mubr.msk.f32.mxu1 %vm1672_vm2, %v1671_v0 }
  0xb2   :  { %1496 = vmatmul.mubr.msk.f32.gmra.mxu0 %vm120_vm0, %v1740_v20 }
  0xb3   :  { %1498 = vmatprep.mubr.msk.f32.mxu0 %vm120_vm0, %v1750_v25 }
  0xb6   :  { %1499 = vmatmul.mubr.msk.f32.gmra.mxu0 %vm120_vm0, %v1760_v29 }
  0xfe   :  { %v259_v54 = vpop.f32.mrf.mxu0  ;;  %v373_v55 = vpop.f32.mrf.mxu1 }
 0x100   :  { %v261_v56 = vpop.f32.mrf.mxu0  ;;  %v1925_v57 = vpop.f32.mrf.mxu1 }
 0x101   :  { %v815_v62 = vrot.slane %v1925_v57, 1  ;;  %v796_v2 = vrot.slane %v261_v56, 1 }
 0x102   :  { %v265_v60 = vpop.f32.mrf.mxu0  ;;  %v379_v61 = vpop.f32.mrf.mxu1 }
 0x104   :  { %v267_v63 = vpop.f32.mrf.mxu0  ;;  %v381_v1 = vpop.f32.mrf.mxu1 }
 0x105   :  { %v797_v3 = vrot.slane %v267_v63, 1  ;;  %v816_v4 = vrot.slane %v381_v1, 1  ;;  %v1205_v1 = vld [vmem:[#allocation8] sm:$0xff] }
 0x106   :  { %v271_v5 = vpop.f32.mrf.mxu0  ;;  %v385_v6 = vpop.f32.mrf.mxu1 }
 0x107   :  { %v845_v8 = vsel %vm822_vm1, %v796_v2, %v797_v3  ;;  %v826_v9 = vsel %vm822_vm1, %v815_v62, %v816_v4 }
 0x108   :  { %v1938_v10 = vadd.f32 %v845_v8, %v259_v54  ;;  %v1940_v11 = vadd.f32 %v826_v9, %v373_v55  ;;  %v273_v12 = vpop.f32.mrf.mxu0  ;;  %v387_v13 = vpop.f32.mrf.mxu1  ;;  %v1206_v54 = vld [vmem:[#allocation8 + $0x8] sm:$0xff] }
 0x109   :  { %v798_v14 = vrot.slane %v273_v12, 1  ;;  %v817_v15 = vrot.slane %v387_v13, 1  ;;  %1530 = vmatpush3.msra.mxu1 %v1206_v54 }
 0x10a   :  { %v277_v16 = vpop.f32.mrf.mxu0  ;;  %v391_v17 = vpop.f32.mrf.mxu1  ;;  %1531 = vmatprep.subr.mxu1 %v1671_v0 }
 0x10b   :  { %v844_v18 = vsel %vm822_vm1, %v797_v3, %v798_v14  ;;  %v825_v19 = vsel %vm822_vm1, %v816_v4, %v817_v15  ;;  %1532 = vmatpush3.msra.mxu1 %v1205_v1 }
 0x10c   :  { %v1947_v20 = vadd.f32 %v844_v18, %v265_v60  ;;  %v1949_v21 = vadd.f32 %v825_v19, %v379_v61  ;;  %v279_v22 = vpop.f32.mrf.mxu0  ;;  %v393_v23 = vpop.f32.mrf.mxu1 }
 0x10d   :  { %v799_v24 = vrot.slane %v279_v22, 1  ;;  %v818_v25 = vrot.slane %v393_v23, 1 }
 0x10e   :  { %v283_v26 = vpop.f32.mrf.mxu0  ;;  %v397_v27 = vpop.f32.mrf.mxu1 }
 0x10f   :  { %v843_v28 = vsel %vm822_vm1, %v798_v14, %v799_v24  ;;  %v824_v29 = vsel %vm822_vm1, %v817_v15, %v818_v25 }
 0x110   :  { %v1955_v30 = vadd.f32 %v843_v28, %v271_v5  ;;  %v1957_v31 = vadd.f32 %v824_v29, %v385_v6  ;;  %v285_v32 = vpop.f32.mrf.mxu0  ;;  %v399_v33 = vpop.f32.mrf.mxu1 }
 0x111   :  { %v800_v36 = vrot.slane %v285_v32, 1  ;;  %v819_v37 = vrot.slane %v399_v33, 1 }
 0x112   :  { %v289_v38 = vpop.f32.mrf.mxu0  ;;  %v1959_v39 = vpop.f32.mrf.mxu1 }
 0x113   :  { %v842_v41 = vsel %vm822_vm1, %v799_v24, %v800_v36  ;;  %v823_v42 = vsel %vm822_vm1, %v818_v25, %v819_v37  ;;  %v846_v43 = vsel %vm822_vm1, %v819_v37, %v796_v2  ;;  %v871_v50 = vrot.slane %v1959_v39, 2 }
 0x114   :  { %v1969_v44 = vadd.f32 %v842_v41, %v277_v16  ;;  %v1971_v45 = vadd.f32 %v823_v42, %v391_v17  ;;  %v1973_v46 = vadd.f32 %v846_v43, %v397_v27  ;;  %v291_v47 = vpop.f32.mrf.mxu0  ;;  %v1975_v48 = vpop.f32.mrf.mxu1 }
 0x115   :  { %v801_v51 = vrot.slane %v291_v47, 1  ;;  %v944_v56 = vrot.slane %v1975_v48, 3 }
 0x116   :  { %v295_v52 = vpop.f32.mrf.mxu0  ;;  %v474_v53 = vpop.f32.mrf.mxu1 }
 0x117   :  { %v841_v55 = vsel %vm822_vm1, %v800_v36, %v801_v51  ;;  %v872_v59 = vrot.slane %v474_v53, 2 }
 0x118   :  { %v1984_v60 = vadd.f32 %v841_v55, %v283_v26  ;;  %v297_v61 = vpop.f32.mrf.mxu0  ;;  %v476_v63 = vpop.f32.mrf.mxu1 }
 0x119   :  { %v918_v2 = vsel %vm895_vm3, %v871_v50, %v872_v59  ;;  %v802_v3 = vrot.slane %v297_v61, 1  ;;  %v945_v4 = vrot.slane %v476_v63, 3 }
 0x11a   :  { %v920_v5 = vadd.f32 %v918_v2, %v1938_v10  ;;  %v301_v6 = vpop.f32.mrf.mxu0  ;;  %v480_v7 = vpop.f32.mrf.mxu1 }
 0x11b   :  { %v840_v8 = vsel %vm822_vm1, %v801_v51, %v802_v3  ;;  %v991_v9 = vsel %vm968_vm4, %v944_v56, %v945_v4  ;;  %v873_v12 = vrot.slane %v480_v7, 2 }
 0x11c   :  { %v852_v13 = vadd.f32 %v840_v8, %v289_v38  ;;  %v2000_v14 = vadd.f32 %v991_v9, %v920_v5  ;;  %v303_v15 = vpop.f32.mrf.mxu0  ;;  %v482_v16 = vpop.f32.mrf.mxu1 }
 0x11d   :  { %v917_v10 = vsel %vm895_vm3, %v872_v59, %v873_v12  ;;  %v803_v17 = vrot.slane %v303_v15, 1  ;;  %v946_v0 = vrot.slane %v482_v16, 3 }
 0x11e   :  { %v921_v18 = vadd.f32 %v917_v10, %v1947_v20  ;;  %v307_v19 = vpop.f32.mrf.mxu0  ;;  %v486_v22 = vpop.f32.mrf.mxu1 }
 0x11f   :  { %v839_v23 = vsel %vm822_vm1, %v802_v3, %v803_v17  ;;  %v990_v24 = vsel %vm968_vm4, %v945_v4, %v946_v0  ;;  %v874_v25 = vrot.slane %v486_v22, 2 }
 0x120   :  { %v2009_v26 = vadd.f32 %v839_v23, %v295_v52  ;;  %v2011_v27 = vadd.f32 %v990_v24, %v921_v18  ;;  %v309_v28 = vpop.f32.mrf.mxu0  ;;  %v488_v29 = vpop.f32.mrf.mxu1 }
 0x121   :  { %v916_v32 = vsel %vm895_vm3, %v873_v12, %v874_v25  ;;  %v804_v33 = vrot.slane %v309_v28, 1  ;;  %v947_v20 = vrot.slane %v488_v29, 3 }
 0x122   :  { %v922_v34 = vadd.f32 %v916_v32, %v1955_v30  ;;  %v313_v35 = vpop.f32.mrf.mxu0  ;;  %v492_v36 = vpop.f32.mrf.mxu1 }
 0x123   :  { %v838_v37 = vsel %vm822_vm1, %v803_v17, %v804_v33  ;;  %v989_v38 = vsel %vm968_vm4, %v946_v0, %v947_v20  ;;  %v875_v40 = vrot.slane %v492_v36, 2 }
 0x124   :  { %v2020_v41 = vadd.f32 %v838_v37, %v301_v6  ;;  %v2022_v42 = vadd.f32 %v989_v38, %v922_v34  ;;  %v315_v43 = vpop.f32.mrf.mxu0  ;;  %v494_v47 = vpop.f32.mrf.mxu1 }
 0x125   :  { %v915_v49 = vsel %vm895_vm3, %v874_v25, %v875_v40  ;;  %v805_v51 = vrot.slane %v315_v43, 1  ;;  %v948_v30 = vrot.slane %v494_v47, 3 }
 0x126   :  { %v923_v52 = vadd.f32 %v915_v49, %v1969_v44  ;;  %v319_v53 = vpop.f32.mrf.mxu0  ;;  %v498_v54 = vpop.f32.mrf.mxu1 }
 0x127   :  { %v837_v55 = vsel %vm822_vm1, %v804_v33, %v805_v51  ;;  %v988_v59 = vsel %vm968_vm4, %v947_v20, %v948_v30  ;;  %v876_v61 = vrot.slane %v498_v54, 2 }
 0x128   :  { %v2031_v63 = vadd.f32 %v837_v55, %v307_v19  ;;  %v2033_v1 = vadd.f32 %v988_v59, %v923_v52  ;;  %v321_v2 = vpop.f32.mrf.mxu0  ;;  %v500_v3 = vpop.f32.mrf.mxu1 }
 0x129   :  { %v914_v4 = vsel %vm895_vm3, %v875_v40, %v876_v61  ;;  %v806_v5 = vrot.slane %v321_v2, 1  ;;  %v949_v44 = vrot.slane %v500_v3, 3 }
 0x12a   :  { %v924_v6 = vadd.f32 %v914_v4, %v1984_v60  ;;  %v325_v7 = vpop.f32.mrf.mxu0  ;;  %v504_v8 = vpop.f32.mrf.mxu1 }
 0x12b   :  { %v836_v9 = vsel %vm822_vm1, %v805_v51, %v806_v5  ;;  %v987_v12 = vsel %vm968_vm4, %v948_v30, %v949_v44  ;;  %v877_v15 = vrot.slane %v504_v8, 2 }
 0x12c   :  { %v2042_v16 = vadd.f32 %v836_v9, %v313_v35  ;;  %v2044_v10 = vadd.f32 %v987_v12, %v924_v6  ;;  %v327_v17 = vpop.f32.mrf.mxu0  ;;  %v506_v0 = vpop.f32.mrf.mxu1 }
 0x12d   :  { %v913_v18 = vsel %vm895_vm3, %v876_v61, %v877_v15  ;;  %v807_v19 = vrot.slane %v327_v17, 1  ;;  %v950_v60 = vrot.slane %v506_v0, 3 }
 0x12e   :  { %v925_v22 = vadd.f32 %v913_v18, %v852_v13  ;;  %v2048_v23 = vpop.f32.mrf.mxu0  ;;  %v510_v24 = vpop.f32.mrf.mxu1 }
 0x12f   :  { %v835_v25 = vsel %vm822_vm1, %v806_v5, %v807_v19  ;;  %v986_v28 = vsel %vm968_vm4, %v949_v44, %v950_v60 }
 0x130   :  { %v2054_v29 = vadd.f32 %v835_v25, %v319_v53  ;;  %v2056_v32 = vadd.f32 %v986_v28, %v925_v22  ;;  %v333_v33 = vpop.f32.mrf.mxu0  ;;  %v512_v20 = vpop.f32.mrf.mxu1  ;;  %v878_v53 = vrot.slane %v510_v24, 2 }
 0x131   :  { %v808_v34 = vrot.slane %v333_v33, 1  ;;  %v951_v5 = vrot.slane %v512_v20, 3 }
 0x132   :  { %v337_v35 = vpop.f32.mrf.mxu0  ;;  %v516_v36 = vpop.f32.mrf.mxu1  ;;  %v912_v4 = vsel %vm895_vm3, %v877_v15, %v878_v53 }
 0x133   :  { %v834_v13 = vsel %vm822_vm1, %v807_v19, %v808_v34  ;;  %v879_v54 = vrot.slane %v516_v36, 2  ;;  %v926_v18 = vadd.f32 %v912_v4, %v2009_v26  ;;  %v985_v15 = vsel %vm968_vm4, %v950_v60, %v951_v5 }
 0x134   :  { %v2060_v37 = vadd.f32 %v834_v13, %v325_v7  ;;  %v339_v38 = vpop.f32.mrf.mxu0  ;;  %v518_v40 = vpop.f32.mrf.mxu1 }
 0x135   :  { %v911_v44 = vsel %vm895_vm3, %v878_v53, %v879_v54  ;;  %v809_v6 = vrot.slane %v339_v38, 1  ;;  %v952_v7 = vrot.slane %v518_v40, 3 }
 0x136   :  { %v2062_v43 = vpop.f32.mrf.mxu0  ;;  %v522_v47 = vpop.f32.mrf.mxu1  ;;  %v927_v25 = vadd.f32 %v911_v44, %v2020_v41 }
 0x137   :  { %v880_v61 = vrot.slane %v522_v47, 2  ;;  %v833_v20 = vsel %vm822_vm1, %v808_v34, %v809_v6  ;;  %v984_v36 = vsel %vm968_vm4, %v951_v5, %v952_v7 }
 0x138   :  { %v345_v49 = vpop.f32.mrf.mxu0  ;;  %v524_v51 = vpop.f32.mrf.mxu1 }
 0x139   :  { %v810_v8 = vrot.slane %v345_v49, 1  ;;  %v910_v17 = vsel %vm895_vm3, %v879_v54, %v880_v61  ;;  %v953_v19 = vrot.slane %v524_v51, 3  ;;  %v2090_v51 = vadd.f32 %v985_v15, %v926_v18 }
 0x13a   :  { %v2064_v30 = vpop.f32.mrf.mxu0  ;;  %v528_v52 = vpop.f32.mrf.mxu1  ;;  %v928_v13 = vadd.f32 %v910_v17, %v2031_v63 }
 0x13b   :  { %v881_v0 = vrot.slane %v528_v52, 2  ;;  %v832_v26 = vsel %vm822_vm1, %v809_v6, %v810_v8  ;;  %v983_v34 = vsel %vm968_vm4, %v952_v7, %v953_v19 }
 0x13c   :  { %v351_v55 = vpop.f32.mrf.mxu0  ;;  %v530_v59 = vpop.f32.mrf.mxu1  ;;  %v860_v44 = vadd.f32 %v832_v26, %v337_v35 }
 0x13d   :  { %v909_v41 = vsel %vm895_vm3, %v880_v61, %v881_v0  ;;  %v811_v60 = vrot.slane %v351_v55, 1  ;;  %v954_v47 = vrot.slane %v530_v59, 3  ;;  %v859_v55 = vadd.f32 %v833_v20, %v2048_v23 }
 0x13e   :  { %v2066_v2 = vpop.f32.mrf.mxu0  ;;  %v534_v3 = vpop.f32.mrf.mxu1  ;;  %v2099_v59 = vadd.f32 %v984_v36, %v927_v25  ;;  %v929_v6 = vadd.f32 %v909_v41, %v2042_v16 }
 0x13f   :  { %v882_v28 = vrot.slane %v534_v3, 2  ;;  %v831_v17 = vsel %vm822_vm1, %v810_v8, %v811_v60 }
 0x140   :  { %v357_v9 = vpop.f32.mrf.mxu0  ;;  %v536_v12 = vpop.f32.mrf.mxu1 }
 0x141   :  { %v812_v49 = vrot.slane %v357_v9, 1  ;;  %v955_v52 = vrot.slane %v536_v12, 3  ;;  %v908_v3 = vsel %vm895_vm3, %v881_v0, %v882_v28  ;;  %v2102_v12 = vadd.f32 %v983_v34, %v928_v13 }
 0x142   :  { %v2075_v22 = vpop.f32.mrf.mxu0  ;;  %v540_v24 = vpop.f32.mrf.mxu1  ;;  %v982_v0 = vsel %vm968_vm4, %v953_v19, %v954_v47  ;;  %v930_v23 = vadd.f32 %v908_v3, %v2054_v29  ;;  %v861_v29 = vadd.f32 %v831_v17, %v2062_v43 }
 0x143   :  { %v883_v33 = vrot.slane %v540_v24, 2  ;;  %v830_v18 = vsel %vm822_vm1, %v811_v60, %v812_v49  ;;  %v981_v35 = vsel %vm968_vm4, %v954_v47, %v955_v52  ;;  %v2121_v36 = vadd.f32 %v982_v0, %v929_v6 }
 0x144   :  { %v363_v38 = vpop.f32.mrf.mxu0  ;;  %v542_v40 = vpop.f32.mrf.mxu1  ;;  %v862_v13 = vadd.f32 %v830_v18, %v2064_v30 }
 0x145   :  { %v813_v63 = vrot.slane %v363_v38, 1  ;;  %v907_v4 = vsel %vm895_vm3, %v882_v28, %v883_v33  ;;  %v956_v5 = vrot.slane %v542_v40, 3 }
 0x146   :  { %v367_v53 = vpop.f32.mrf.mxu0  ;;  %v546_v54 = vpop.f32.mrf.mxu1  ;;  %v931_v16 = vadd.f32 %v907_v4, %v2060_v37 }
 0x147   :  { %v884_v61 = vrot.slane %v546_v54, 2  ;;  %v829_v24 = vsel %vm822_vm1, %v812_v49, %v813_v63  ;;  %v980_v8 = vsel %vm968_vm4, %v955_v52, %v956_v5 }
 0x148   :  { %v369_v7 = vpop.f32.mrf.mxu0  ;;  %v548_v9 = vpop.f32.mrf.mxu1  ;;  %v2132_v49 = vadd.f32 %v829_v24, %v2066_v2  ;;  %v2134_v43 = vadd.f32 %v980_v8, %v931_v16  ;;  %v2146_v2 = vld [vmem:[#allocation7] sm:$0xff]  ;;  %v2167_v8 = vld [vmem:[#allocation7 + $0x8] sm:$0xff] }
 0x149   :  { %v906_v19 = vsel %vm895_vm3, %v883_v33, %v884_v61  ;;  %v814_v28 = vrot.slane %v369_v7, 1  ;;  %v957_v37 = vrot.slane %v548_v9, 3  ;;  %v2129_v33 = vadd.f32 %v981_v35, %v930_v23 }
 0x14a   :  { %v552_v15 = vpop.f32.mrf.mxu1  ;;  %v1467_v25 = vpop.f32.mrf.mxu0  ;;  %v932_v34 = vadd.f32 %v906_v19, %v859_v55 }
 0x14b   :  { %v885_v20 = vrot.slane %v552_v15, 2  ;;  %v1018_v41 = vrot.slane %v1467_v25, 4  ;;  %v827_v54 = vsel %vm822_vm1, %v814_v28, %v815_v62  ;;  %v828_v3 = vsel %vm822_vm1, %v813_v63, %v814_v28 }
 0x14c   :  { %v554_v26 = vpop.f32.mrf.mxu1  ;;  %v2124_v38 = vpop.f32.mrf.mxu0  ;;  %v979_v55 = vsel %vm968_vm4, %v956_v5, %v957_v37  ;;  %v2156_v23 = vadd.f32 %v828_v3, %v2075_v22  ;;  %v2158_v35 = vadd.f32 %v827_v54, %v367_v53  ;;  %v2169_v22 = vld [vmem:[#allocation7 + $0x10] sm:$0xff] }
 0x14d   :  { %v905_v40 = vsel %vm895_vm3, %v884_v61, %v885_v20  ;;  %v958_v60 = vrot.slane %v554_v26, 3  ;;  %v1017_v47 = vrot.slane %v2124_v38, 4  ;;  %v2171_v19 = vadd.f32 %v979_v55, %v932_v34 }
 0x14e   :  { %v558_v30 = vpop.f32.mrf.mxu1  ;;  %v1470_v52 = vpop.f32.mrf.mxu0  ;;  %v933_v6 = vadd.f32 %v905_v40, %v860_v44 }
 0x14f   :  { %v1064_v4 = vsel %vm1041_vm5, %v1017_v47, %v1018_v41  ;;  %v886_v61 = vrot.slane %v558_v30, 2  ;;  %v978_v57 = vsel %vm968_vm4, %v957_v37, %v958_v60  ;;  %v1020_v17 = vrot.slane %v1470_v52, 4 }
 0x150   :  { %v1066_v62 = vadd.f32 %v1064_v4, %v2000_v14  ;;  %v560_v7 = vpop.f32.mrf.mxu1  ;;  %v687_v9 = vpop.f32.mrf.mxu0  ;;  %v2173_v28 = vadd.f32 %v978_v57, %v933_v6 }
 0x151   :  { %v904_v63 = vsel %vm895_vm3, %v885_v20, %v886_v61  ;;  %v959_v0 = vrot.slane %v560_v7, 3  ;;  %v1019_v18 = vrot.slane %v687_v9, 4 }
 0x152   :  { %v1093_v5 = vadd.f32 %v2146_v2, %v1066_v62  ;;  %v934_v44 = vadd.f32 %v904_v63, %v861_v29  ;;  %v564_v16 = vpop.f32.mrf.mxu1  ;;  %v1473_v24 = vpop.f32.mrf.mxu0 }
 0x153   :  { %v977_v14 = vsel %vm968_vm4, %v958_v60, %v959_v0  ;;  %v1062_v15 = vsel %vm1041_vm5, %v1019_v18, %v1020_v17  ;;  %v1063_v25 = vsel %vm1041_vm5, %v1018_v41, %v1019_v18  ;;  %v887_v53 = vrot.slane %v564_v16, 2 }
 0x154   :  { %v1067_v20 = vadd.f32 %v1063_v25, %v2011_v27  ;;  %v1068_v29 = vadd.f32 %v1062_v15, %v2022_v42  ;;  %v566_v37 = vpop.f32.mrf.mxu1  ;;  %v697_v26 = vpop.f32.mrf.mxu0  ;;  %v1022_v60 = vrot.slane %v1473_v24, 4  ;;  %v1117_v52 = vmax.f32 %v1093_v5, 0.0 }
 0x155   :  { %v903_v40 = vsel %vm895_vm3, %v886_v61, %v887_v53  ;;  %v960_v41 = vrot.slane %v566_v37, 3  ;;  %v1021_v30 = vrot.slane %v697_v26, 4  ;;  %v2179_v54 = vadd.f32 %v977_v14, %v934_v44 }
 0x156   :  { %v1094_v34 = vadd.f32 %v2167_v8, %v1067_v20  ;;  %v1095_v3 = vadd.f32 %v2169_v22, %v1068_v29  ;;  %v570_v4 = vpop.f32.mrf.mxu1  ;;  %v1476_v55 = vpop.f32.mrf.mxu0  ;;  %v935_v27 = vadd.f32 %v903_v40, %v862_v13 }
 0x157   :  { %v1060_v42 = vsel %vm1041_vm5, %v1021_v30, %v1022_v60  ;;  %v1061_v6 = vsel %vm1041_vm5, %v1020_v17, %v1021_v30  ;;  %v888_v61 = vrot.slane %v570_v4, 2  ;;  %v976_v7 = vsel %vm968_vm4, %v959_v0, %v960_v41 }
 0x158   :  { %v1118_v57 = vmax.f32 %v1094_v34, 0.0  ;;  %v1119_v62 = vmax.f32 %v1095_v3, 0.0  ;;  %v1069_v9 = vadd.f32 %v1061_v6, %v2033_v1  ;;  %v572_v63 = vpop.f32.mrf.mxu1  ;;  %v707_v18 = vpop.f32.mrf.mxu0  ;;  %v1070_v5 = vadd.f32 %v1060_v42, %v2044_v10 }
 0x159   :  { %v902_v13 = vsel %vm895_vm3, %v887_v53, %v888_v61  ;;  %v1024_v44 = vrot.slane %v1476_v55, 4  ;;  %v961_v16 = vrot.slane %v572_v63, 3  ;;  %v1023_v15 = vrot.slane %v707_v18, 4 }
 0x15a   :  { %v1141_v24 = vmax.f32 %v1117_v52, %v1118_v57  ;;  %v1096_v17 = vadd.f32 %v2146_v2, %v1069_v9  ;;  %v936_v14 = vadd.f32 %v902_v13, %v2132_v49  ;;  %v576_v25 = vpop.f32.mrf.mxu1  ;;  %v1479_v20 = vpop.f32.mrf.mxu0  ;;  %v2195_v0 = vadd.f32 %v976_v7, %v935_v27 }
 0x15b   :  { %v1097_v1 = vadd.f32 %v2167_v8, %v1070_v5  ;;  %v975_v10 = vsel %vm968_vm4, %v960_v41, %v961_v16  ;;  %v889_v29 = vrot.slane %v576_v25, 2  ;;  %v1058_v26 = vsel %vm1041_vm5, %v1023_v15, %v1024_v44 }
 0x15c   :  { %v1142_v37 = vmax.f32 %v1141_v24, %v1119_v62  ;;  %v1120_v53 = vmax.f32 %v1096_v17, 0.0  ;;  %v1026_v40 = vrot.slane %v1479_v20, 4  ;;  %v578_v30 = vpop.f32.mrf.mxu1  ;;  %v717_v52 = vpop.f32.mrf.mxu0  ;;  %v1059_v34 = vsel %vm1041_vm5, %v1022_v60, %v1023_v15 }
 0x15d   :  { %v1121_v49 = vmax.f32 %v1097_v1, 0.0  ;;  %v1072_v3 = vadd.f32 %v1058_v26, %v2090_v51  ;;  %v901_v4 = vsel %vm895_vm3, %v888_v61, %v889_v29  ;;  %v2207_v41 = vadd.f32 %v975_v10, %v936_v14 }
 0x15e   :  { %v1143_v55 = vrot.slane %v1142_v37, 4  ;;  %v1071_v27 = vadd.f32 %v1059_v34, %v2056_v32  ;;  %v962_v42 = vrot.slane %v578_v30, 3  ;;  %v582_v6 = vpop.f32.mrf.mxu1  ;;  %v2210_v57 = vpop.f32.mrf.mxu0  ;;  %v1025_v9 = vrot.slane %v717_v52, 4 }
 0x15f   :  { %v1149_v62 = vmax.f32 %v1120_v53, %v1121_v49  ;;  %v1099_v7 = vadd.f32 %v2146_v2, %v1072_v3  ;;  %v890_v63 = vrot.slane %v582_v6, 2  ;;  %v937_v18 = vadd.f32 %v901_v4, %v2156_v23 }
 0x160   :  { %v1144_v60 = vmax.f32 %v1142_v37, %v1143_v55  ;;  %v1098_v51 = vadd.f32 %v2169_v22, %v1071_v27  ;;  %v974_v61 = vsel %vm968_vm4, %v961_v16, %v962_v42  ;;  %v584_v5 = vpop.f32.mrf.mxu1  ;;  %v727_v13 = vpop.f32.mrf.mxu0  ;;  %v1056_v24 = vsel %vm1041_vm5, %v1025_v9, %v1026_v40 }
 0x161   :  { %v1123_v32 = vmax.f32 %v1099_v7, 0.0  ;;  %v1057_v17 = vsel %vm1041_vm5, %v1024_v44, %v1025_v9  ;;  %v1028_v14 = vrot.slane %v2210_v57, 4  ;;  %v1074_v23 = vadd.f32 %v1056_v24, %v2102_v12 }
 0x162   :  { %v1145_v15 = vrot.slane %v1144_v60, 2  ;;  %v1122_v25 = vmax.f32 %v1098_v51, 0.0  ;;  %v1073_v20 = vadd.f32 %v1057_v17, %v2099_v59  ;;  %v588_v1 = vpop.f32.mrf.mxu1  ;;  %v2224_v10 = vpop.f32.mrf.mxu0  ;;  %v900_v16 = vsel %vm895_vm3, %v889_v29, %v890_v63 }
 0x163   :  { %v963_v37 = vrot.slane %v584_v5, 3  ;;  %v1027_v53 = vrot.slane %v727_v13, 4  ;;  %v891_v26 = vrot.slane %v588_v1, 2  ;;  %v1101_v49 = vadd.f32 %v2169_v22, %v1074_v23 }
 0x164   :  { %v1146_v30 = vmax.f32 %v1144_v60, %v1145_v15  ;;  %v1150_v52 = vmax.f32 %v1149_v62, %v1122_v25  ;;  %v1100_v44 = vadd.f32 %v2167_v8, %v1073_v20  ;;  %v2230_v34 = vpop.f32.mrf.mxu1  ;;  %v737_v59 = vpop.f32.mrf.mxu0  ;;  %v938_v12 = vadd.f32 %v900_v16, %v2158_v35 }
 0x165   :  { %v973_v3 = vsel %vm968_vm4, %v962_v42, %v963_v37  ;;  %v1054_v29 = vsel %vm1041_vm5, %v1027_v53, %v1028_v14  ;;  %v1055_v4 = vsel %vm1041_vm5, %v1026_v40, %v1027_v53  ;;  %v2239_v6 = vadd.f32 %v974_v61, %v937_v18 }
 0x166   :  { %v1147_v55 = vrot.slane %v1146_v30, 1  ;;  %v1151_v27 = vrot.slane %v1150_v52, 4  ;;  %v1124_v57 = vmax.f32 %v1100_v44, 0.0  ;;  %v2241_v62 = vpop.f32.mrf.mxu1  ;;  %v2243_v7 = vpop.f32.mrf.mxu0  ;;  %v1125_v9 = vmax.f32 %v1101_v49, 0.0 }
 0x167   :  { %v1075_v35 = vadd.f32 %v1055_v4, %v2121_v36  ;;  %v1076_v42 = vadd.f32 %v1054_v29, %v2129_v33  ;;  %v899_v60 = vsel %vm895_vm3, %v890_v63, %v891_v26  ;;  %v2249_v40 = vadd.f32 %v973_v3, %v938_v12 }
 0x168   :  { %v1152_v51 = vmax.f32 %v1150_v52, %v1151_v27  ;;  %v1157_v5 = vmax.f32 %v1123_v32, %v1124_v57  ;;  %v939_v18 = vadd.f32 %v899_v60, %v1940_v11  ;;  %v596_v61 = vpop.f32.mrf.mxu1  ;;  %v747_v13 = vpop.f32.mrf.mxu0  ;;  %v1030_v15 = vrot.slane %v2224_v10, 4 }
 0x169   :  { %v1102_v24 = vadd.f32 %v2146_v2, %v1075_v35  ;;  %v1103_v17 = vadd.f32 %v2167_v8, %v1076_v42  ;;  %v964_v36 = vrot.slane %v2230_v34, 3  ;;  %v1029_v20 = vrot.slane %v737_v59, 4 }
 0x16a   :  { %v1153_v33 = vrot.slane %v1152_v51, 2  ;;  %v1158_v25 = vmax.f32 %v1157_v5, %v1125_v9  ;;  %v892_v63 = vrot.slane %v2241_v62, 2  ;;  %v2257_v32 = vpop.f32.mrf.mxu1  ;;  %v2259_v23 = vpop.f32.mrf.mxu0  ;;  %v2261_v11 = vmax.f32 %v1146_v30, %v1147_v55 }
 0x16b   :  { %v1126_v1 = vmax.f32 %v1102_v24, 0.0  ;;  %v1127_v16 = vmax.f32 %v1103_v17, 0.0  ;;  %v972_v53 = vsel %vm968_vm4, %v963_v37, %v964_v36  ;;  %v1052_v44 = vsel %vm1041_vm5, %v1029_v20, %v1030_v15 }
 0x16c   :  { %v1154_v52 = vmax.f32 %v1152_v51, %v1153_v33  ;;  %v1159_v10 = vrot.slane %v1158_v25, 4  ;;  %v1032_v49 = vrot.slane %v2243_v7, 4  ;;  %v757_v34 = vpop.f32.mrf.mxu0  ;;  %v1053_v12 = vsel %vm1041_vm5, %v1028_v14, %v1029_v20  ;;  %v2273_v29 = vpop.f32.mrf.mxu1 }
 0x16d   :  { %v1165_v59 = vmax.f32 %v1126_v1, %v1127_v16  ;;  %v1078_v30 = vadd.f32 %v1052_v44, %v2171_v19  ;;  %v898_v3 = vsel %vm895_vm3, %v891_v26, %v892_v63  ;;  %v2275_v55 = vadd.f32 %v972_v53, %v939_v18 }
 0x16e   :  { %v1155_v37 = vrot.slane %v1154_v52, 1  ;;  %v1160_v4 = vmax.f32 %v1158_v25, %v1159_v10  ;;  %v1077_v27 = vadd.f32 %v1053_v12, %v2134_v43  ;;  %v2278_v57 = vpop.f32.mrf.mxu0  ;;  %v965_v7 = vrot.slane %v596_v61, 3  ;;  %v606_v61 = vpop.f32.mrf.mxu1 }
 0x16f   :  { %v1105_v62 = vadd.f32 %v2146_v2, %v1078_v30  ;;  %v1031_v9 = vrot.slane %v747_v13, 4  ;;  %v893_v14 = vrot.slane %v2257_v32, 2  ;;  %v940_v42 = vadd.f32 %v898_v3, %v1949_v21 }
 0x170   :  { %v2282_v19 = vmax.f32 %v1154_v52, %v1155_v37  ;;  %v1161_v35 = vrot.slane %v1160_v4, 2  ;;  %v1104_v26 = vadd.f32 %v2169_v22, %v1077_v27  ;;  %v2286_v60 = vpop.f32.mrf.mxu0  ;;  %v1034_v18 = vrot.slane %v2259_v23, 4  ;;  %v608_v44 = vpop.f32.mrf.mxu1 }
 0x171   :  { %v1129_v51 = vmax.f32 %v1105_v62, 0.0  ;;  %v1050_v43 = vsel %vm1041_vm5, %v1031_v9, %v1032_v49  ;;  %v1051_v5 = vsel %vm1041_vm5, %v1030_v15, %v1031_v9  ;;  %v971_v17 = vsel %vm968_vm4, %v964_v36, %v965_v7 }
 0x172   :  { %v1162_v13 = vmax.f32 %v1160_v4, %v1161_v35  ;;  %v1128_v24 = vmax.f32 %v1104_v26, 0.0  ;;  %v1079_v33 = vadd.f32 %v1051_v5, %v2173_v28  ;;  %v2296_v21 = vpop.f32.mrf.mxu0  ;;  %v1080_v25 = vadd.f32 %v1050_v43, %v2179_v54 }
 0x173   :  { %v897_v20 = vsel %vm895_vm3, %v892_v63, %v893_v14  ;;  %v966_v32 = vrot.slane %v2273_v29, 3  ;;  %v1033_v15 = vrot.slane %v757_v34, 4  ;;  %v1013_v12 = vadd.f32 %v971_v17, %v940_v42 }
 0x174   :  { %v1163_v1 = vrot.slane %v1162_v13, 1  ;;  %v1166_v16 = vmax.f32 %v1165_v59, %v1128_v24  ;;  %v1106_v53 = vadd.f32 %v2167_v8, %v1079_v33  ;;  %v941_v52 = vadd.f32 %v897_v20, %v1957_v31  ;;  %v777_v10 = vpop.f32.mrf.mxu0 }
 0x175   :  { %v1107_v36 = vadd.f32 %v2169_v22, %v1080_v25  ;;  %v970_v28 = vsel %vm968_vm4, %v965_v7, %v966_v32  ;;  %v1048_v54 = vsel %vm1041_vm5, %v1033_v15, %v1034_v18  ;;  %v1049_v63 = vsel %vm1041_vm5, %v1032_v49, %v1033_v15 }
 0x176   :  { %v2313_v34 = vmax.f32 %v1162_v13, %v1163_v1  ;;  %v1167_v59 = vrot.slane %v1166_v16, 4  ;;  %v1130_v31 = vmax.f32 %v1106_v53, 0.0  ;;  %v2315_v30 = vadd.f32 %v970_v28, %v941_v52  ;;  %v1500_v4 = vpop.f32.mrf.mxu0 }
 0x177   :  { %v1081_v3 = vadd.f32 %v1049_v63, %v2195_v0  ;;  %v1082_v29 = vadd.f32 %v1048_v54, %v2207_v41  ;;  %v894_v37 = vrot.slane %v606_v61, 2  ;;  %v1131_v62 = vmax.f32 %v1107_v36, 0.0 }
 0x178   :  { %v1168_v27 = vmax.f32 %v1166_v16, %v1167_v59  ;;  %v1173_v7 = vmax.f32 %v1129_v51, %v1130_v31  ;;  %v967_v9 = vrot.slane %v608_v44, 3  ;;  %v787_v39 = vpop.f32.mrf.mxu0  ;;  %v1036_v17 = vrot.slane %v2278_v57, 4 }
 0x179   :  { %v1108_v49 = vadd.f32 %v2146_v2, %v1081_v3  ;;  %v1109_v35 = vadd.f32 %v2167_v8, %v1082_v29  ;;  %v896_v26 = vsel %vm895_vm3, %v893_v14, %v894_v37  ;;  %v919_v0 = vsel %vm895_vm3, %v894_v37, %v871_v50 }
 0x17a   :  { %v1169_v42 = vrot.slane %v1168_v27, 2  ;;  %v1174_v41 = vmax.f32 %v1173_v7, %v1131_v62  ;;  %v942_v43 = vadd.f32 %v896_v26, %v1971_v45  ;;  %v943_v5 = vadd.f32 %v919_v0, %v1973_v46 }
 0x17b   :  { %v1132_v51 = vmax.f32 %v1108_v49, 0.0  ;;  %v1133_v61 = vmax.f32 %v1109_v35, 0.0  ;;  %v969_v13 = vsel %vm968_vm4, %v966_v32, %v967_v9  ;;  %v992_v14 = vsel %vm968_vm4, %v967_v9, %v944_v56 }
 0x17c   :  { %v1170_v24 = vmax.f32 %v1168_v27, %v1169_v42  ;;  %v1175_v50 = vrot.slane %v1174_v41, 4  ;;  %v1016_v33 = vadd.f32 %v992_v14, %v943_v5  ;;  %v1015_v45 = vadd.f32 %v969_v13, %v942_v43 }
 0x17d   :  { %v1035_v46 = vrot.slane %v2286_v60, 4  ;;  %v1038_v25 = vrot.slane %v2296_v21, 4  ;;  %v1037_v20 = vrot.slane %v777_v10, 4  ;;  %v1181_v48 = vmax.f32 %v1132_v51, %v1133_v61 }
 0x17e   :  { %v1176_v32 = vmax.f32 %v1174_v41, %v1175_v50  ;;  %v1040_v15 = vrot.slane %v1500_v4, 4  ;;  %v1039_v1 = vrot.slane %v787_v39, 4  ;;  %v1171_v16 = vrot.slane %v1170_v24, 1 }
 0x17f   :  { %v1046_v56 = vsel %vm1041_vm5, %v1035_v46, %v1036_v17  ;;  %v1047_v57 = vsel %vm1041_vm5, %v1034_v18, %v1035_v46  ;;  %v1044_v60 = vsel %vm1041_vm5, %v1037_v20, %v1038_v25  ;;  %v1045_v21 = vsel %vm1041_vm5, %v1036_v17, %v1037_v20 }
 0x180   :  { %v1177_v53 = vrot.slane %v1176_v32, 2  ;;  %v1083_v52 = vadd.f32 %v1047_v57, %v2239_v6  ;;  %v1084_v10 = vadd.f32 %v1046_v56, %v2249_v40  ;;  %v1085_v36 = vadd.f32 %v1045_v21, %v2275_v55  ;;  %v1411_v56 = vld [vmem:[%s2384_s4] ss:$0 sm:$0xff] }
 0x181   :  { %v1086_v28 = vadd.f32 %v1044_v60, %v1013_v12  ;;  %v1065_v23 = vsel %vm1041_vm5, %v1040_v15, %v1017_v47  ;;  %v1042_v18 = vsel %vm1041_vm5, %v1039_v1, %v1040_v15  ;;  %v1043_v55 = vsel %vm1041_vm5, %v1038_v25, %v1039_v1 }
 0x182   :  { %v1178_v54 = vmax.f32 %v1176_v32, %v1177_v53  ;;  %v1110_v63 = vadd.f32 %v2169_v22, %v1083_v52  ;;  %v1111_v44 = vadd.f32 %v2146_v2, %v1084_v10  ;;  %v1089_v59 = vadd.f32 %v1065_v23, %v1016_v33 }
 0x183   :  { %v1112_v6 = vadd.f32 %v2167_v8, %v1085_v36  ;;  %v1113_v40 = vadd.f32 %v2169_v22, %v1086_v28  ;;  %v1088_v38 = vadd.f32 %v1042_v18, %v1015_v45  ;;  %v1172_v12 = vmax.f32 %v1170_v24, %v1171_v16 }
 0x184   :  { %v1179_v31 = vrot.slane %v1178_v54, 1  ;;  %v1134_v47 = vmax.f32 %v1110_v63, 0.0  ;;  %v1135_v3 = vmax.f32 %v1111_v44, 0.0  ;;  %v1116_v37 = vadd.f32 %v2169_v22, %v1089_v59 }
 0x185   :  { %v1136_v29 = vmax.f32 %v1112_v6, 0.0  ;;  %v1087_v4 = vadd.f32 %v1043_v55, %v2315_v30  ;;  %v1115_v27 = vadd.f32 %v2167_v8, %v1088_v38  ;;  %v1137_v9 = vmax.f32 %v1113_v40, 0.0 }
 0x186   :  { %v1180_v62 = vmax.f32 %v1178_v54, %v1179_v31  ;;  %v1182_v7 = vmax.f32 %v1181_v48, %v1134_v47  ;;  %v1237_v58 = vsel %vm1236_vm6, %v2282_v19, %v2261_v11  ;;  %v1140_v51 = vmax.f32 %v1116_v37, 0.0 }
 0x187   :  { %v1189_v49 = vmax.f32 %v1135_v3, %v1136_v29  ;;  %v1114_v35 = vadd.f32 %v2146_v2, %v1087_v4  ;;  %v1139_v26 = vmax.f32 %v1115_v27, 0.0  ;;  %v1239_v0 = vsel %vm1238_vm7, %v2313_v34, %v1237_v58 }
 0x188   :  { %v1183_v42 = vrot.slane %v1182_v7, 4  ;;  %v1241_v22 = vsel %vm1240_vm8, %v1172_v12, %v1239_v0 }
 0x189   :  { %v1190_v30 = vmax.f32 %v1189_v49, %v1137_v9  ;;  %v1138_v41 = vmax.f32 %v1114_v35, 0.0  ;;  %v1243_v8 = vsel %vm1242_vm9, %v1180_v62, %v1241_v22 }
 0x18a   :  { %v1184_v43 = vmax.f32 %v1182_v7, %v1183_v42 }
 0x18b   :  { %v1191_v5 = vrot.slane %v1190_v30, 4  ;;  %v1197_v61 = vmax.f32 %v1138_v41, %v1139_v26 }
 0x18c   :  { %v1185_v13 = vrot.slane %v1184_v43, 2 }
 0x18d   :  { %v1192_v11 = vmax.f32 %v1190_v30, %v1191_v5  ;;  %v1198_v19 = vmax.f32 %v1197_v61, %v1140_v51 }
 0x18e   :  { %v1186_v14 = vmax.f32 %v1184_v43, %v1185_v13 }
 0x18f   :  { %v1193_v2 = vrot.slane %v1192_v11, 2  ;;  %v1199_v39 = vrot.slane %v1198_v19, 4 }
 0x190   :  { %v1187_v24 = vrot.slane %v1186_v14, 1 }
 0x191   :  { %v1200_v50 = vmax.f32 %v1198_v19, %v1199_v39  ;;  %v1194_v34 = vmax.f32 %v1192_v11, %v1193_v2 }
 0x192   :  { %v1188_v17 = vmax.f32 %v1186_v14, %v1187_v24 }
 0x193   :  { %v1195_v33 = vrot.slane %v1194_v34, 1  ;;  %v1201_v45 = vrot.slane %v1200_v50, 2 }
 0x194   :  { %v1245_v20 = vsel %vm1244_vm10, %v1188_v17, %v1243_v8 }
 0x195   :  { %v1196_v46 = vmax.f32 %v1194_v34, %v1195_v33  ;;  %v1202_v25 = vmax.f32 %v1200_v50, %v1201_v45 }
 0x197   :  { %v1203_v32 = vrot.slane %v1202_v25, 1  ;;  %v1247_v48 = vsel %vm1246_vm11, %v1196_v46, %v1245_v20 }
 0x199   :  { %v1204_v15 = vmax.f32 %v1202_v25, %v1203_v32 }
 0x19b   :  { %v1249_v1 = vsel %vm1248_vm12, %v1204_v15, %v1247_v48 }
 0x19c   :  { %1534 = vmatmul.mubr.f32.vlgmr.msra.gmra.mxu1 %v1249_v1 }
 0x25c   :  { %v1317_v57 = vpop.f32.mrf.mxu1 }
 0x25d   :  { %v1318_v60 = vadd.f32 %v1411_v56, %v1317_v57 }
 0x25e   :  { %v1535_v21 = vpop.f32.mrf.mxu1 }
 0x25f   :  { %1321 = vst [vmem:[#allocation10] sm:$0xff] %v1318_v60 }
 0x260   :  { %1646 = shalt.err (!%p1643_p10)
}
 0x261   :  { %1331 = dma.vmem_to_hbm [thread:$0]  %s1329_s16, 128, %s2385_s5, [#allocation4]  }
 0x262   :  { %1661 = dma.done.wait [#allocation4], 128  }
 0x263   :  { %1662 = vsyncadd [#allocation4], 4294967168 }
 0x264   :  { %1335 = vsyncpa [#allocation3], 1 }
 0x265   :  { %1336 = vsyncpa [#allocation6], 1 }
 0x266   :  { %1337 = vsyncpa [#allocation9], 1 }
 0x267   :  { %1338 = vsyncpa [#allocation4], 1 }

</bundles_post_ra>
